<compile_context>
chip_gen: v5e
topology: v5e:2x2
jax: 0.10.0
libtpu: 0.0.40
codegen_flags: <defaults>
</compile_context>

<pallas_src>
import functools

import jax
import jax.numpy as jnp
from jax.experimental import pallas as pl
from jax.experimental.pallas import tpu as pltpu

LANE = 128
MIB = 1024 * 1024


def _round_up(x, m):
    return ((x + m - 1) // m) * m


def _pick_tile(n_padded, max_tile):
    """Largest multiple of 128 that divides n_padded and is <= max_tile."""
    best = LANE
    t = LANE
    while t <= min(max_tile, n_padded):
        if n_padded % t == 0:
            best = t
        t += LANE
    return best


def _default_vmem_limit():
    try:
        cap = pltpu.get_tpu_info().vmem_capacity_bytes
        return int(max(32 * MIB, min(int(0.75 * cap), 96 * MIB)))
    except Exception:
        return 48 * MIB  # safe on every generation (v7x has 64 MiB physical per TC)


# ---------------- prologue:  Y = X @ W1  (reassociated layer 0) ----------------
def _xw1_kernel(x_ref, w1_ref, y_ref):
    y_ref[...] = jnp.dot(x_ref[...], w1_ref[...],
                         preferred_element_type=jnp.float32).astype(y_ref.dtype)


# ---------------- pass 1:  P = relu(dinv * (B @ Y) + b1) @ W2 ----------------
def _layer0_kernel(b_ref, y_ref, dinv_ref, b1_ref, w2_ref, p_ref, acc_ref, *,
                   tk, y_resident):
    k = pl.program_id(1)

    @pl.when(k == 0)
    def _():
        acc_ref[...] = jnp.zeros_like(acc_ref)

    # 0/1 structure tile: int8 in HBM (bandwidth), bf16 on the MXU (exact for small ints).
    b_tile = b_ref[...].astype(jnp.float32).astype(jnp.bfloat16)
    if y_resident:
        off = pl.multiple_of(k * tk, tk)
        y_tile = y_ref[pl.ds(off, tk), :]          # slice the VMEM-resident Y
    else:
        y_tile = y_ref[...]                        # streamed K-tile
    acc_ref[...] += jnp.dot(b_tile, y_tile, preferred_element_type=jnp.float32)

    @pl.when(k == pl.num_programs(1) - 1)
    def _():
        h1 = acc_ref[...] * dinv_ref[...] + b1_ref[...]    # exact f32 mean + bias
        h1 = jnp.maximum(h1, 0.0)                          # ReLU (dropout = identity in eval)
        # project down *before* the second big propagation:  A @ (h1 @ W2)
        p = jnp.dot(h1.astype(jnp.bfloat16), w2_ref[...],
                    preferred_element_type=jnp.float32)
        p_ref[...] = p.astype(p_ref.dtype)


# ---------------- pass 2:  out = log_softmax(dinv * (B @ P) + b2) ----------------
def _layer1_kernel(b_ref, p_ref, dinv_ref, b2_ref, out_ref, acc_ref, *,
                   tk, p_resident, num_classes):
    k = pl.program_id(1)

    @pl.when(k == 0)
    def _():
        acc_ref[...] = jnp.zeros_like(acc_ref)

    b_tile = b_ref[...].astype(jnp.float32).astype(jnp.bfloat16)
    if p_resident:
        off = pl.multiple_of(k * tk, tk)
        p_tile = p_ref[pl.ds(off, tk), :]
    else:
        p_tile = p_ref[...]
    acc_ref[...] += jnp.dot(b_tile, p_tile, preferred_element_type=jnp.float32)

    @pl.when(k == pl.num_programs(1) - 1)
    def _():
        h2 = acc_ref[...] * dinv_ref[...] + b2_ref[...]
        # mask lane-padding columns so they do not pollute the softmax normalizer
        col = jax.lax.broadcasted_iota(jnp.int32, h2.shape, dimension=1)
        h2 = jnp.where(col < num_classes, h2, -1e30)
        m = jnp.max(h2, axis=1, keepdims=True)
        s = h2 - m
        lse = jnp.log(jnp.sum(jnp.exp(s), axis=1, keepdims=True))
        out_ref[...] = s - lse


def mmgnn_forward(B, deg_inv, X, W1, b1, W2, b2, *, block=512, vmem_limit_bytes=None):
    """B: dense 0/1 adjacency structure (B[dst, src] = multiplicity); deg_inv: [N,1] f32."""
    N, F = X.shape
    H = W1.shape[1]
    C = W2.shape[1]

    if vmem_limit_bytes is None:
        vmem_limit_bytes = _default_vmem_limit()

    # ---- lane-dense padding (multiples of 128 on every last dim) ----
    Np = _round_up(N, LANE)
    Fp = _round_up(F, LANE)
    Hp = _round_up(H, LANE)
    Cp = _round_up(C, LANE)

    # tm == tk (no lcm blow-up); keep >= 2 row tiles when possible for megacore sharding.
    max_tile = min(block, max(LANE, Np // 2)) if Np >= 2 * LANE else LANE
    tm = tk = _pick_tile(Np, max_tile)
    n_row = Np // tm
    n_k = Np // tk

    # ---- host-side packing: int8 structure, exact f32 1/deg, bf16 MXU operands ----
    B_p = jnp.zeros((Np, Np), jnp.int8).at[:N, :N].set(B.astype(jnp.int8))
    dinv_p = jnp.ones((Np, 1), jnp.float32).at[:N, :].set(
        deg_inv.reshape(N, 1).astype(jnp.float32))
    X_p = jnp.zeros((Np, Fp), jnp.bfloat16).at[:N, :F].set(X.astype(jnp.bfloat16))
    W1_p = jnp.zeros((Fp, Hp), jnp.bfloat16).at[:F, :H].set(W1.astype(jnp.bfloat16))
    W2_p = jnp.zeros((Hp, Cp), jnp.bfloat16).at[:H, :C].set(W2.astype(jnp.bfloat16))
    b1_p = jnp.zeros((1, Hp), jnp.float32).at[0, :H].set(b1.astype(jnp.float32))
    b2_p = jnp.zeros((1, Cp), jnp.float32).at[0, :C].set(b2.astype(jnp.float32))

    cparams = pltpu.CompilerParams(
        dimension_semantics=("parallel", "arbitrary"),
        vmem_limit_bytes=vmem_limit_bytes,
    )

    # ---- prologue: Y = X @ W1 ----
    cost_y = pl.CostEstimate(
        flops=2 * Np * Fp * Hp, transcendentals=0,
        bytes_accessed=2 * (Np * Fp + Fp * Hp + Np * Hp))
    Y = pl.pallas_call(
        _xw1_kernel,
        out_shape=jax.ShapeDtypeStruct((Np, Hp), jnp.bfloat16),
        grid_spec=pltpu.PrefetchScalarGridSpec(
            num_scalar_prefetch=0,
            grid=(n_row,),
            in_specs=[pl.BlockSpec((tm, Fp), lambda i: (i, 0)),
                      pl.BlockSpec((Fp, Hp), lambda i: (0, 0))],
            out_specs=pl.BlockSpec((tm, Hp), lambda i: (i, 0)),
        ),
        compiler_params=pltpu.CompilerParams(
            dimension_semantics=("parallel",),
            vmem_limit_bytes=vmem_limit_bytes),
        cost_estimate=cost_y,
    )(X_p, W1_p)

    # ---- VMEM-residency gate for the narrow operands (per-generation budget) ----
    resident_budget = vmem_limit_bytes // 4
    y_resident = (Np * Hp * 2) <= resident_budget
    p_resident = (Np * Cp * 2) <= resident_budget

    grid = (n_row, n_k)

    # ---- pass 1:  P = relu(dinv * (B @ Y) + b1) @ W2 ----
    y_spec = (pl.BlockSpec((Np, Hp), lambda i, k: (0, 0)) if y_resident
              else pl.BlockSpec((tk, Hp), lambda i, k: (k, 0)))
    y_replay = 1 if y_resident else n_row
    cost1 = pl.CostEstimate(
        flops=2 * Np * Np * Hp + 2 * Np * Hp * Cp,
        transcendentals=0,
        bytes_accessed=(Np * Np                      # int8 structure stream
                        + 2 * Np * Hp * y_replay     # Y (replayed only if streamed)
                        + 4 * Np + 4 * Hp + 2 * Hp * Cp
                        + 2 * Np * Cp))
    P = pl.pallas_call(
        functools.partial(_layer0_kernel, tk=tk, y_resident=y_resident),
        out_shape=jax.ShapeDtypeStruct((Np, Cp), jnp.bfloat16),
        grid_spec=pltpu.PrefetchScalarGridSpec(
            num_scalar_prefetch=0,
            grid=grid,
            in_specs=[
                pl.BlockSpec((tm, tk), lambda i, k: (i, k)),   # B tile (int8 stream)
                y_spec,                                        # Y (resident or K-tile)
                pl.BlockSpec((tm, 1), lambda i, k: (i, 0)),    # 1/deg rows (f32)
                pl.BlockSpec((1, Hp), lambda i, k: (0, 0)),    # b1 (resident)
                pl.BlockSpec((Hp, Cp), lambda i, k: (0, 0)),   # W2 (resident)
            ],
            out_specs=pl.BlockSpec((tm, Cp), lambda i, k: (i, 0)),
            scratch_shapes=[pltpu.VMEM((tm, Hp), jnp.float32)],
        ),
        compiler_params=cparams,
        cost_estimate=cost1,
    )(B_p, Y, dinv_p, b1_p, W2_p)

    # ---- pass 2:  out = log_softmax(dinv * (B @ P) + b2) ----
    p_spec = (pl.BlockSpec((Np, Cp), lambda i, k: (0, 0)) if p_resident
              else pl.BlockSpec((tk, Cp), lambda i, k: (k, 0)))
    p_replay = 1 if p_resident else n_row
    cost2 = pl.CostEstimate(
        flops=2 * Np * Np * Cp,
        transcendentals=Np * Cp,
        bytes_accessed=(Np * Np
                        + 2 * Np * Cp * p_replay
                        + 4 * Np + 4 * Cp
                        + 4 * Np * Cp))
    out = pl.pallas_call(
        functools.partial(_layer1_kernel, tk=tk, p_resident=p_resident, num_classes=C),
        out_shape=jax.ShapeDtypeStruct((Np, Cp), jnp.float32),
        grid_spec=pltpu.PrefetchScalarGridSpec(
            num_scalar_prefetch=0,
            grid=grid,
            in_specs=[
                pl.BlockSpec((tm, tk), lambda i, k: (i, k)),   # B tile (int8 stream)
                p_spec,                                        # P (resident or K-tile)
                pl.BlockSpec((tm, 1), lambda i, k: (i, 0)),    # 1/deg rows (f32)
                pl.BlockSpec((1, Cp), lambda i, k: (0, 0)),    # b2 (resident)
            ],
            out_specs=pl.BlockSpec((tm, Cp), lambda i, k: (i, 0)),
            scratch_shapes=[pltpu.VMEM((tm, Cp), jnp.float32)],
        ),
        compiler_params=cparams,
        cost_estimate=cost2,
    )(B_p, P, dinv_p, b2_p)

    return out[:N, :C]


def build_adj_struct(edge_index, num_nodes):
    """0/1 structure (B[dst, src] = multiplicity) + exact f32 inverse in-degree.

    Duplicate edges are counted multiply and isolated nodes aggregate to 0, matching a plain
    scatter-mean over the given edge list."""
    src = edge_index[0]
    dst = edge_index[1]
    Bm = jnp.zeros((num_nodes, num_nodes), dtype=jnp.float32).at[dst, src].add(1.0)
    deg = jnp.sum(Bm, axis=1, keepdims=True)
    deg_inv = 1.0 / jnp.maximum(deg, 1.0)
    return Bm, deg_inv


def mmgnn_reference(Bm, deg_inv, X, W1, b1, W2, b2):
    A = Bm * deg_inv
    h1 = jnp.maximum(A @ X @ W1 + b1, 0.0)
    h2 = A @ h1 @ W2 + b2
    return jax.nn.log_softmax(h2, axis=1)


def glorot(key, shape):
    fan_in, fan_out = shape
    lim = jnp.sqrt(6.0 / (fan_in + fan_out))
    return jax.random.uniform(key, shape, jnp.float32, -lim, lim)


if __name__ == "__main__":
    # Small shapes consistent with the module:
    #   dataset.num_features = 16, hidden = 32, dataset.num_classes = 8
    N = 32   # number of graph nodes
    F = 16   # num_features
    H = 32   # hidden
    C = 8    # num_classes
    E = 64   # number of edges

    key = jax.random.PRNGKey(0)
    kx, ke1, ke2, kw1, kw2 = jax.random.split(key, 5)

    # data.x: [N, F] node features ; data.edge_index: [2, E]
    X = jax.random.normal(kx, (N, F), dtype=jnp.float32)
    edge_index = jnp.stack(
        [
            jax.random.randint(ke1, (E,), 0, N),   # src (col)
            jax.random.randint(ke2, (E,), 0, N),   # dst (row)
        ],
        axis=0,
    )

    # Deterministic parameter init (MM_Conv linear layers)
    W1 = glorot(kw1, (F, H))
    b1 = jnp.zeros((H,), dtype=jnp.float32)
    W2 = glorot(kw2, (H, C))
    b2 = jnp.zeros((C,), dtype=jnp.float32)

    Bm, deg_inv = build_adj_struct(edge_index, N)

    out = mmgnn_forward(Bm, deg_inv, X, W1, b1, W2, b2)
    out = jax.block_until_ready(out)

    # sanity: shape, rows sum to ~1 in prob space, and close to the f32 JAX reference
    assert out.shape == (N, C)
    assert bool(jnp.all(jnp.isfinite(out)))
    assert jnp.allclose(jnp.sum(jnp.exp(out), axis=1), 1.0, atol=1e-3)
    ref = mmgnn_reference(Bm, deg_inv, X, W1, b1, W2, b2)
    assert jnp.allclose(out, ref, atol=5e-2), float(jnp.max(jnp.abs(out - ref)))

    print("KERNEL_OK")
</pallas_src>

<mosaic_0001>
module attributes {stable_mosaic.version = 11 : i64} {
  func.func @_xw1_kernel(%arg0: i32, %arg1: memref<128x128xbf16, #tpu.memory_space<vmem>>, %arg2: memref<128x128xbf16, #tpu.memory_space<vmem>>, %arg3: memref<128x128xbf16, #tpu.memory_space<vmem>>) attributes {dimension_semantics = [#tpu.dimension_semantics<parallel>], iteration_bounds = array<i64: 1>, scalar_prefetch = 0 : i64, scratch_operands = 0 : i64, tpu.core_type = #tpu.core_type<tc>, window_params = [{transform_indices = @transform_0, window_bounds = array<i64: 128, 128>}, {pipeline_mode = #tpu.pipeline_mode<synchronous>, transform_indices = @transform_1, window_bounds = array<i64: 128, 128>}, {transform_indices = @transform_2, window_bounds = array<i64: 128, 128>}]} {
    %c0 = arith.constant 0 : index
    %c0_0 = arith.constant 0 : index
    %0 = vector.load %arg1[%c0, %c0_0] : memref<128x128xbf16, #tpu.memory_space<vmem>>, vector<128x128xbf16>
    %c0_1 = arith.constant 0 : index
    %c0_2 = arith.constant 0 : index
    %1 = vector.load %arg2[%c0_1, %c0_2] : memref<128x128xbf16, #tpu.memory_space<vmem>>, vector<128x128xbf16>
    %cst = arith.constant dense<0.000000e+00> : vector<128x128xf32>
    %2 = tpu.matmul %0, %1, %cst {dimension_numbers = #tpu.dot_dimension_numbers<[1], [0], [0], [1], [0, 0, 1, 1], [], []>} : vector<128x128xbf16>, vector<128x128xbf16>, vector<128x128xf32> -> vector<128x128xf32>
    %3 = arith.truncf %2 : vector<128x128xf32> to vector<128x128xbf16>
    %c0_3 = arith.constant 0 : index
    %c0_4 = arith.constant 0 : index
    %4 = vector.load %arg3[%c0_3, %c0_4] : memref<128x128xbf16, #tpu.memory_space<vmem>>, vector<128x128xbf16>
    tpu.vector_store %arg3[%c0_3, %c0_4], %3 {strides = array<i32>} : memref<128x128xbf16, #tpu.memory_space<vmem>>, vector<128x128xbf16>,
    return
  }
  func.func @transform_0(%arg0: i32) -> (i32, i32) {
    %c0_i32 = arith.constant 0 : i32
    %c0_i32_0 = arith.constant 0 : i32
    return %arg0, %c0_i32 : i32, i32
  }
  func.func @transform_1(%arg0: i32) -> (i32, i32) {
    %c0_i32 = arith.constant 0 : i32
    %c0_i32_0 = arith.constant 0 : i32
    %c0_i32_1 = arith.constant 0 : i32
    return %c0_i32, %c0_i32_0 : i32, i32
  }
  func.func @transform_2(%arg0: i32) -> (i32, i32) {
    %c0_i32 = arith.constant 0 : i32
    %c0_i32_0 = arith.constant 0 : i32
    return %arg0, %c0_i32 : i32, i32
  }
}

</mosaic_0001>

<bundles_post_ra>
// kernel: tpu_custom_call.1
= control target key start
LH: loop header
LB: loop body
LE: loop exit
PB: predicated region body
PF: predicated region fallthrough
CT: control target
= control target key end

     0   :  { %7 = vsyncpa [#allocation3], 0  ;;  %s545_s0 = inlined_call_operand.hbm [shape: bf16[128,128], index: 0, kind: input, shape index: {}]   ;;  %s546_s1 = inlined_call_operand.hbm [shape: bf16[128,128], index: 1, kind: input, shape index: {}]   ;;  %s547_s2 = inlined_call_operand.hbm [shape: bf16[128,128], index: 2, kind: output, shape index: {}]  }
   0x1   :  { %8 = vsyncpa [#allocation6], 0 }
   0x2   :  { %9 = vsyncpa [#allocation4], 0  ;;  %s14_s11 = sshll.u32 %s545_s0, 4  ;;  %s507_s12 = smov [#allocation2]   ;;  %s15_s11 = int_to_ptr.hbm [resolvable:$true] %s14_s11 }
   0x3   :  { %s16_s13 = sshll.u32 %s507_s12, 4  ;;  %s27_s16 = sshll.u32 %s546_s1, 4  ;;  %s17_s13 = int_to_ptr.vmem [resolvable:$true] %s16_s13  ;;  %s28_s16 = int_to_ptr.hbm [resolvable:$true] %s27_s16 }
   0x4   :  { %s508_s17 = smov 64   ;;  %s509_s18 = smov 4  }
   0x5   :  { %22 = dma.hbm_to_vmem [thread:$0]  %s15_s11, 1024, %s17_s13, [#allocation3], %s508_s17, %s508_s17, %s509_s18  }
   0x6   :  { %s510_s19 = smov [#allocation5]  }
   0x7   :  { %s29_s20 = sshll.u32 %s510_s19, 4  ;;  %s30_s20 = int_to_ptr.vmem [resolvable:$true] %s29_s20 }
   0x8   :  { %35 = dma.hbm_to_vmem [thread:$0]  %s28_s16, 1024, %s30_s20, [#allocation6], %s508_s17, %s508_s17, %s509_s18  }
   0x9   :  { %501 = dma.done.wait [#allocation3], 1024  }
   0xa   :  { %502 = vsyncadd [#allocation3], 4294966272 }
   0xb   :  { %503 = dma.done.wait [#allocation6], 1024  }
   0xc   :  { %504 = vsyncadd [#allocation6], 4294966272  ;;  %v352_v0 = vld [vmem:[#allocation5 + $0x38] sm:$0xff]  ;;  %v351_v1 = vld [vmem:[#allocation5 + $0x30] sm:$0xff]  ;;  %s511_s0 = smov [#allocation7]   ;;  %s259_s23 = sshll.u32 %s547_s2, 4  ;;  %s260_s23 = int_to_ptr.hbm [resolvable:$true] %s259_s23 }
   0xd   :  { %172 = vmatpush.bf16.msra.mxu0 %v352_v0  ;;  %400 = vmatpush.bf16.msra.mxu1 %v352_v0  ;;  %v350_v2 = vld [vmem:[#allocation5 + $0x28] sm:$0xff]  ;;  %v349_v3 = vld [vmem:[#allocation5 + $0x20] sm:$0xff]  ;;  %v348_v4 = vld [vmem:[#allocation5 + $0x18] sm:$0xff]  ;;  %s257_s1 = sshll.u32 %s511_s0, 4  ;;  %s258_s1 = int_to_ptr.vmem [resolvable:$true] %s257_s1 }
   0xe   :  { %401 = vmatpush.bf16.msra.mxu2 %v352_v0  ;;  %402 = vmatpush.bf16.msra.mxu3 %v352_v0  ;;  %v347_v5 = vld [vmem:[#allocation5 + $0x10] sm:$0xff]  ;;  %v346_v6 = vld [vmem:[#allocation5 + $0x8] sm:$0xff]  ;;  %v345_v7 = vld [vmem:[#allocation5] sm:$0xff] }
   0xf   :  { %v337_v8 = vld [vmem:[#allocation2] sm:$0xff]  ;;  %v339_v9 = vld [vmem:[#allocation2 + $0x10] sm:$0xff]  ;;  %v338_v12 = vld [vmem:[#allocation2 + $0x8] sm:$0xff] }
  0x10   :  { %v341_v10 = vld [vmem:[#allocation2 + $0x20] sm:$0xff]  ;;  %v343_v11 = vld [vmem:[#allocation2 + $0x30] sm:$0xff]  ;;  %v340_v13 = vld [vmem:[#allocation2 + $0x18] sm:$0xff] }
  0x11   :  { %173 = vmatpush.bf16.msra.mxu0 %v351_v1  ;;  %403 = vmatpush.bf16.msra.mxu1 %v351_v1  ;;  %v342_v14 = vld [vmem:[#allocation2 + $0x28] sm:$0xff]  ;;  %v344_v15 = vld [vmem:[#allocation2 + $0x38] sm:$0xff] }
  0x12   :  { %404 = vmatpush.bf16.msra.mxu2 %v351_v1  ;;  %405 = vmatpush.bf16.msra.mxu3 %v351_v1 }
  0x15   :  { %174 = vmatpush.bf16.msra.mxu0 %v350_v2  ;;  %406 = vmatpush.bf16.msra.mxu1 %v350_v2 }
  0x16   :  { %407 = vmatpush.bf16.msra.mxu2 %v350_v2  ;;  %408 = vmatpush.bf16.msra.mxu3 %v350_v2 }
  0x19   :  { %175 = vmatpush.bf16.msra.mxu0 %v349_v3  ;;  %409 = vmatpush.bf16.msra.mxu1 %v349_v3 }
  0x1a   :  { %410 = vmatpush.bf16.msra.mxu2 %v349_v3  ;;  %411 = vmatpush.bf16.msra.mxu3 %v349_v3 }
  0x1d   :  { %176 = vmatpush.bf16.msra.mxu0 %v348_v4  ;;  %412 = vmatpush.bf16.msra.mxu1 %v348_v4 }
  0x1e   :  { %413 = vmatpush.bf16.msra.mxu2 %v348_v4  ;;  %414 = vmatpush.bf16.msra.mxu3 %v348_v4 }
  0x21   :  { %177 = vmatpush.bf16.msra.mxu0 %v347_v5  ;;  %415 = vmatpush.bf16.msra.mxu1 %v347_v5 }
  0x22   :  { %416 = vmatpush.bf16.msra.mxu2 %v347_v5  ;;  %417 = vmatpush.bf16.msra.mxu3 %v347_v5 }
  0x25   :  { %178 = vmatpush.bf16.msra.mxu0 %v346_v6  ;;  %418 = vmatpush.bf16.msra.mxu1 %v346_v6 }
  0x26   :  { %419 = vmatpush.bf16.msra.mxu2 %v346_v6  ;;  %420 = vmatpush.bf16.msra.mxu3 %v346_v6 }
  0x29   :  { %179 = vmatpush.bf16.msra.mxu0 %v345_v7  ;;  %421 = vmatpush.bf16.msra.mxu1 %v345_v7 }
  0x2a   :  { %422 = vmatpush.bf16.msra.mxu2 %v345_v7  ;;  %423 = vmatpush.bf16.msra.mxu3 %v345_v7 }
  0x2c   :  { %180 = vmatmul.bf16.vlgmr.msra.gmra.mxu0 %v337_v8  ;;  %190 = vmatmul.bf16.vlgmr.msra.gmra.mxu1 %v339_v9 }
  0x2d   :  { %200 = vmatmul.bf16.vlgmr.msra.gmra.mxu2 %v341_v10  ;;  %210 = vmatmul.bf16.vlgmr.msra.gmra.mxu3 %v343_v11 }
  0x3c   :  { %185 = vmatmul.bf16.gmra.mxu0 %v338_v12  ;;  %195 = vmatmul.bf16.gmra.mxu1 %v340_v13 }
  0x3d   :  { %205 = vmatmul.bf16.gmra.mxu2 %v342_v14  ;;  %215 = vmatmul.bf16.gmra.mxu3 %v344_v15 }
  0xa9   :  { %v181_v16 = vpop.f32.mrf.mxu0  ;;  %v191_v17 = vpop.f32.mrf.mxu1 }
  0xb0   :  { %v201_v18 = vpop.f32.mrf.mxu2  ;;  %v211_v19 = vpop.f32.mrf.mxu3 }
  0xb1   :  { %v183_v20 = vpop.f32.mrf.mxu0  ;;  %v193_v21 = vpop.f32.mrf.mxu1 }
  0xb2   :  { %v356_v22 = vpack.c.bf16 %v183_v20, %v181_v16  ;;  %v366_v23 = vpack.c.bf16 %v193_v21, %v191_v17 }
  0xb4   :  { %357 = vst [vmem:[#allocation7] sm:$0xff] %v356_v22  }
  0xb5   :  { %394 = vst [vmem:[#allocation7 + $0x10] sm:$0xff] %v366_v23  }
  0xb8   :  { %v203_v24 = vpop.f32.mrf.mxu2  ;;  %v213_v25 = vpop.f32.mrf.mxu3 }
  0xb9   :  { %v376_v26 = vpack.c.bf16 %v203_v24, %v201_v18  ;;  %v386_v27 = vpack.c.bf16 %v213_v25, %v211_v19  ;;  %v186_v28 = vpop.f32.mrf.mxu0  ;;  %v196_v29 = vpop.f32.mrf.mxu1 }
  0xbb   :  { %396 = vst [vmem:[#allocation7 + $0x20] sm:$0xff] %v376_v26  }
  0xbc   :  { %398 = vst [vmem:[#allocation7 + $0x30] sm:$0xff] %v386_v27  }
  0xc0   :  { %v206_v30 = vpop.f32.mrf.mxu2  ;;  %v216_v31 = vpop.f32.mrf.mxu3 }
  0xc1   :  { %v188_v32 = vpop.f32.mrf.mxu0  ;;  %v198_v33 = vpop.f32.mrf.mxu1 }
  0xc2   :  { %v361_v34 = vpack.c.bf16 %v188_v32, %v186_v28  ;;  %v371_v35 = vpack.c.bf16 %v198_v33, %v196_v29 }
  0xc4   :  { %393 = vst [vmem:[#allocation7 + $0x8] sm:$0xff] %v361_v34  }
  0xc5   :  { %395 = vst [vmem:[#allocation7 + $0x18] sm:$0xff] %v371_v35  }
  0xc8   :  { %v208_v36 = vpop.f32.mrf.mxu2  ;;  %v218_v37 = vpop.f32.mrf.mxu3 }
  0xc9   :  { %v381_v38 = vpack.c.bf16 %v208_v36, %v206_v30  ;;  %v391_v39 = vpack.c.bf16 %v218_v37, %v216_v31 }
  0xcb   :  { %397 = vst [vmem:[#allocation7 + $0x28] sm:$0xff] %v381_v38  }
  0xcc   :  { %399 = vst [vmem:[#allocation7 + $0x38] sm:$0xff] %v391_v39  }
  0xcd   :  { %265 = dma.vmem_to_hbm [thread:$0]  %s258_s1, 1024, %s260_s23, [#allocation4], %s508_s17, %s508_s17, %s509_s18  }
  0xce   :  { %505 = dma.done.wait [#allocation4], 1024  }
  0xcf   :  { %506 = vsyncadd [#allocation4], 4294966272 }
  0xd0   :  { %270 = vsyncpa [#allocation3], 1 }
  0xd1   :  { %271 = vsyncpa [#allocation6], 1 }
  0xd2   :  { %272 = vsyncpa [#allocation4], 1 }

</bundles_post_ra>
